<compile_context>
chip_gen: v5e
topology: v5e:2x2
jax: 0.10.0
libtpu: 0.0.40
codegen_flags: <defaults>
</compile_context>

<pallas_src>
import functools

import jax
import jax.numpy as jnp
import numpy as np
from jax.experimental import pallas as pl
from jax.experimental.pallas import tpu as pltpu


# 2 Mi elements per block -> 20 MiB double-buffered (1 B in + 4 B out, x2).
_DEFAULT_BLOCK_ELEMS = 2 * 1024 * 1024
# Explicit scoped-VMEM limit: safe on v5e/v6e (128 MiB physical) and v7x
# (64 MiB physical); raises v5e's 16 MiB default so the big blocks fit.
_VMEM_LIMIT_BYTES = 32 << 20
# Double-buffered bytes per element (u8 in + f32 out).
_BYTES_PER_ELEM_DB = 2 * (1 + 4)
# Candidate lane-dense widths (multiples of 128) for the flattened-slab view,
# widest first (wider lanes -> denser unmasked f32 vst for the output stream).
_LANE_WIDTHS = (4096, 2048, 1024, 896, 768, 640, 512, 384, 256, 128)


def _scale_kernel(x_ref, o_ref):
    # x_ref: (TR, L) uint8 tile; o_ref: (TR, L) float32 tile.
    # True divide (not multiply-by-reciprocal) to track torchvision's .div(255).
    o_ref[...] = x_ref[...].astype(jnp.float32) / 255.0


def _round_down_mult(x, m):
    return max(m, (x // m) * m)


@functools.lru_cache(maxsize=None)
def _pick_block_elems():
    """Default block size; only ever shrinks if the part has little VMEM."""
    try:
        cap = pltpu.get_tpu_info().vmem_capacity_bytes
    except Exception:  # pragma: no cover - info query unavailable
        return _DEFAULT_BLOCK_ELEMS
    budget = min(_VMEM_LIMIT_BYTES, max(cap // 2, 8 << 20))
    return int(min(_DEFAULT_BLOCK_ELEMS, budget // _BYTES_PER_ELEM_DB))


def _streaming_call(slab, tile_rows):
    """slab: (rows, width) uint8 -> (rows, width) float32 via a 1D row-tiled grid."""
    rows, width = slab.shape
    spec = pl.BlockSpec((tile_rows, width), lambda i: (i, 0))
    total_bytes = rows * width * 5  # 1 B u8 read + 4 B f32 write per element
    return pl.pallas_call(
        _scale_kernel,
        out_shape=jax.ShapeDtypeStruct(slab.shape, jnp.float32),
        grid=(pl.cdiv(rows, tile_rows),),
        in_specs=[spec],
        out_specs=spec,
        compiler_params=pltpu.CompilerParams(
            dimension_semantics=("parallel",),
            vmem_limit_bytes=_VMEM_LIMIT_BYTES,
        ),
        cost_estimate=pl.CostEstimate(
            flops=0, transcendentals=0, bytes_accessed=total_bytes
        ),
    )(slab)


@functools.partial(jax.jit, static_argnames=("block_elems",))
def _to_tensor_impl(pic, block_elems):
    batched = pic.ndim == 4
    x = pic if batched else pic[None]
    N, H, W, C = x.shape

    # HWC -> CHW uint8 de-interleave: one XLA copy pass (see module TODO on
    # fusing it in-kernel).  transpose + reshape fuse into a single copy under
    # jit; the reshape below is then free (NCHW is contiguous).
    chw = jnp.transpose(x, (0, 3, 1, 2))  # (N, C, H, W) uint8

    total = N * C * H * W
    lane = next((lw for lw in _LANE_WIDTHS if total % lw == 0), None)

    if lane is not None:
        # Lane-dense path: view the whole NCHW buffer as one (rows, lane) slab
        # whose last dim is a multiple of 128 -> unmasked f32 vector stores
        # for the dominant HBM stream.  Tiles may span channel/image
        # boundaries (elementwise), so blocks reach the full target size.
        rows = total // lane
        slab = chw.reshape(rows, lane)
        tr = min(rows, _round_down_mult(max(block_elems // lane, 32), 32))
        out = _streaming_call(slab, tr)
    else:
        # Fallback for odd sizes (total not a multiple of 128): merge N*C*H
        # into the row axis, keep the full (legal) W as the last block dim;
        # stores may be masked but per-step overhead is still amortized.
        # TODO(synk): split W into a lane-dense (W//128)*128 slab + remainder
        # to confine masked f32 stores to a sliver.
        rows = N * C * H
        slab = chw.reshape(rows, W)
        tr = min(rows, _round_down_mult(max(block_elems // W, 32), 32))
        out = _streaming_call(slab, tr)

    out = out.reshape(N, C, H, W)
    return out if batched else out[0]


def to_tensor(pic, *, block_elems=None):
    """Pallas equivalent of torchvision F.to_tensor for uint8 images.

    Args:
      pic: (H, W, C) or (N, H, W, C) uint8 array (PIL/numpy HWC convention).
      block_elems: elements per pipelined block (tuning knob; default is
        generation-aware and targets a ~20 MiB double-buffered working set).
    Returns:
      (C, H, W) or (N, C, H, W) float32 array in [0, 1].
    """
    assert pic.dtype == jnp.uint8, "to_tensor kernel models the uint8 path"
    if block_elems is None:
        block_elems = _pick_block_elems()
    return _to_tensor_impl(pic, int(block_elems))


def _reference(pic):
    if pic.ndim == 4:
        return jnp.transpose(pic, (0, 3, 1, 2)).astype(jnp.float32) / 255.0
    return jnp.transpose(pic, (2, 0, 1)).astype(jnp.float32) / 255.0


if __name__ == "__main__":
    key = jax.random.PRNGKey(0)
    k1, k2, k3 = jax.random.split(key, 3)

    # Test 1: batched, lane-dense merged-slab path, single block.
    N, H, W, C = 2, 64, 128, 3
    pics = jax.random.randint(k1, (N, H, W, C), 0, 256, dtype=jnp.int32).astype(jnp.uint8)
    out = jax.block_until_ready(to_tensor(pics))
    assert out.shape == (N, C, H, W) and out.dtype == jnp.float32
    np.testing.assert_allclose(np.asarray(out), np.asarray(_reference(pics)),
                               rtol=1e-6, atol=1e-7)

    # Test 2: lane-dense path with a small block override -> multi-tile 1D grid
    # with a partial (masked) trailing row block spanning plane boundaries.
    N2, H2, W2 = 2, 288, 128
    pics2 = jax.random.randint(k2, (N2, H2, W2, C), 0, 256, dtype=jnp.int32).astype(jnp.uint8)
    out2 = jax.block_until_ready(to_tensor(pics2, block_elems=16 * 1024))
    assert out2.shape == (N2, C, H2, W2) and out2.dtype == jnp.float32
    np.testing.assert_allclose(np.asarray(out2), np.asarray(_reference(pics2)),
                               rtol=1e-6, atol=1e-7)

    # Test 3: single unbatched image with odd spatial size (fallback path,
    # merged N*C*H rows, single block).
    H3, W3, C3 = 37, 100, 3
    pic3 = jax.random.randint(k3, (H3, W3, C3), 0, 256, dtype=jnp.int32).astype(jnp.uint8)
    out3 = jax.block_until_ready(to_tensor(pic3))
    assert out3.shape == (C3, H3, W3) and out3.dtype == jnp.float32
    np.testing.assert_allclose(np.asarray(out3), np.asarray(_reference(pic3)),
                               rtol=1e-6, atol=1e-7)

    # Test 4: fallback path with a small block override -> multi-tile grid.
    out4 = jax.block_until_ready(to_tensor(pic3, block_elems=3200))
    np.testing.assert_allclose(np.asarray(out4), np.asarray(_reference(pic3)),
                               rtol=1e-6, atol=1e-7)

    print("KERNEL_OK")
</pallas_src>

<mosaic_0001>
module attributes {stable_mosaic.version = 11 : i64} {
  func.func @_scale_kernel(%arg0: i32, %arg1: memref<12x4096xi8, #tpu.memory_space<vmem>>, %arg2: memref<12x4096xf32, #tpu.memory_space<vmem>>) attributes {dimension_semantics = [#tpu.dimension_semantics<parallel>], iteration_bounds = array<i64: 1>, scalar_prefetch = 0 : i64, scratch_operands = 0 : i64, tpu.core_type = #tpu.core_type<tc>, window_params = [{transform_indices = @transform_0, window_bounds = array<i64: 12, 4096>}, {transform_indices = @transform_1, window_bounds = array<i64: 12, 4096>}]} {
    %c0 = arith.constant 0 : index
    %c0_0 = arith.constant 0 : index
    %0 = vector.load %arg1[%c0, %c0_0] : memref<12x4096xi8, #tpu.memory_space<vmem>>, vector<12x4096xi8>
    %1 = arith.uitofp %0 : vector<12x4096xi8> to vector<12x4096xf32>
    %cst = arith.constant 2.550000e+02 : f32
    %2 = vector.broadcast %cst : f32 to vector<12x4096xf32>
    %3 = arith.divf %1, %2 : vector<12x4096xf32>
    %c0_1 = arith.constant 0 : index
    %c0_2 = arith.constant 0 : index
    %4 = vector.load %arg2[%c0_1, %c0_2] : memref<12x4096xf32, #tpu.memory_space<vmem>>, vector<12x4096xf32>
    tpu.vector_store %arg2[%c0_1, %c0_2], %3 {strides = array<i32>} : memref<12x4096xf32, #tpu.memory_space<vmem>>, vector<12x4096xf32>,
    return
  }
  func.func @transform_0(%arg0: i32) -> (i32, i32) {
    %c0_i32 = arith.constant 0 : i32
    %c0_i32_0 = arith.constant 0 : i32
    return %arg0, %c0_i32 : i32, i32
  }
  func.func @transform_1(%arg0: i32) -> (i32, i32) {
    %c0_i32 = arith.constant 0 : i32
    %c0_i32_0 = arith.constant 0 : i32
    return %arg0, %c0_i32 : i32, i32
  }
}

</mosaic_0001>

<bundles_post_ra>
// kernel: _to_tensor_impl.1
= control target key start
LH: loop header
LB: loop body
LE: loop exit
PB: predicated region body
PF: predicated region fallthrough
CT: control target
= control target key end

     0   :  { %v358_v1 = vmov 255.0   ;;  %s675_s0 = inlined_call_operand.vmem [shape: u8[12,4096], index: 0, kind: input, shape index: {}]   ;;  %s676_s1 = inlined_call_operand.vmem [shape: f32[12,4096], index: 1, kind: output, shape index: {}]  }
   0x1   :  { %v8_v0 = vld [vmem:[%s675_s0] sm:$0xff]  ;;  %356 = vrcp.f32 %v358_v1  ;;  %v9_v2 = vld [vmem:[%s675_s0 + $0x8] sm:$0xff]  ;;  %v10_v14 = vld [vmem:[%s675_s0 + $0x10] sm:$0xff] }
   0x2   :  { %v24_v3 = vunpack.c.0.s8 %v8_v0  ;;  %v25_v4 = vunpack.c.1.s8 %v8_v0  ;;  %v26_v5 = vunpack.c.2.s8 %v8_v0  ;;  %v27_v6 = vunpack.c.3.s8 %v8_v0  ;;  %v11_v27 = vld [vmem:[%s675_s0 + $0x18] sm:$0xff]  ;;  %v12_v43 = vld [vmem:[%s675_s0 + $0x20] sm:$0xff]  ;;  %v13_v60 = vld [vmem:[%s675_s0 + $0x28] sm:$0xff] }
   0x3   :  { %v28_v7 = vunpack.c.0.s8 %v9_v2  ;;  %v29_v9 = vunpack.c.1.s8 %v9_v2  ;;  %v30_v10 = vunpack.c.2.s8 %v9_v2  ;;  %v31_v13 = vunpack.c.3.s8 %v9_v2 }
   0x4   :  { %v88_v11 = vand.u32 255, %v24_v3  ;;  %v89_v15 = vand.u32 255, %v25_v4  ;;  %v90_v16 = vand.u32 255, %v26_v5  ;;  %v91_v18 = vand.u32 255, %v27_v6 }
   0x5   :  { %v92_v19 = vand.u32 255, %v28_v7  ;;  %v93_v20 = vand.u32 255, %v29_v9  ;;  %v94_v21 = vand.u32 255, %v30_v10  ;;  %v32_v22 = vunpack.c.0.s8 %v10_v14 }
   0x6   :  { %v152_v23 = vcvt.s32.f32 %v88_v11  ;;  %v95_v25 = vand.u32 255, %v31_v13  ;;  %v33_v26 = vunpack.c.1.s8 %v10_v14  ;;  %v153_v28 = vcvt.s32.f32 %v89_v15  ;;  %v14_v13 = vld [vmem:[%s675_s0 + $0x30] sm:$0xff] }
   0x7   :  { %v357_v8 = vpop.eup %356  ;;  %v154_v29 = vcvt.s32.f32 %v90_v16  ;;  %v34_v30 = vunpack.c.2.s8 %v10_v14  ;;  %v155_v32 = vcvt.s32.f32 %v91_v18  ;;  %v156_v33 = vcvt.s32.f32 %v92_v19 }
   0x8   :  { %v217_v12 = vmul.f32 255.0, %v357_v8  ;;  %vm221_vm0 = vweird.f32 %v357_v8  ;;  %v35_v34 = vunpack.c.3.s8 %v10_v14  ;;  %v157_v35 = vcvt.s32.f32 %v93_v20 }
   0x9   :  { %v158_v36 = vcvt.s32.f32 %v94_v21  ;;  %v96_v37 = vand.u32 255, %v32_v22  ;;  %v36_v38 = vunpack.c.0.s8 %v11_v27  ;;  %v97_v40 = vand.u32 255, %v33_v26 }
   0xa   :  { %v218_v17 = vsub.f32 1.0, %v217_v12  ;;  %v37_v41 = vunpack.c.1.s8 %v11_v27  ;;  %v38_v42 = vunpack.c.2.s8 %v11_v27  ;;  %v98_v47 = vand.u32 255, %v34_v30  ;;  %v15_v30 = vld [vmem:[%s675_s0 + $0x38] sm:$0xff] }
   0xb   :  { %v159_v49 = vcvt.s32.f32 %v95_v25  ;;  %v99_v50 = vand.u32 255, %v35_v34  ;;  %v39_v51 = vunpack.c.3.s8 %v11_v27  ;;  %v160_v53 = vcvt.s32.f32 %v96_v37 }
   0xc   :  { %v219_v24 = vmul.f32 %v357_v8, %v218_v17  ;;  %v100_v54 = vand.u32 255, %v36_v38  ;;  %v40_v55 = vunpack.c.0.s8 %v12_v43  ;;  %v161_v57 = vcvt.s32.f32 %v97_v40 }
   0xd   :  { %v101_v58 = vand.u32 255, %v37_v41  ;;  %v41_v59 = vunpack.c.1.s8 %v12_v43  ;;  %v162_v62 = vcvt.s32.f32 %v98_v47  ;;  %v102_v63 = vand.u32 255, %v38_v42 }
   0xe   :  { %v220_v31 = vadd.f32 %v357_v8, %v219_v24  ;;  %v42_v0 = vunpack.c.2.s8 %v12_v43  ;;  %v163_v2 = vcvt.s32.f32 %v99_v50  ;;  %v103_v3 = vand.u32 255, %v39_v51 }
   0xf   :  { %v43_v4 = vunpack.c.3.s8 %v12_v43  ;;  %v164_v6 = vcvt.s32.f32 %v100_v54  ;;  %v104_v7 = vand.u32 255, %v40_v55  ;;  %v165_v10 = vcvt.s32.f32 %v101_v58 }
  0x10   :  { %v381_v39 = vsel %vm221_vm0, %v357_v8, %v220_v31  ;;  %v44_v8 = vunpack.c.0.s8 %v13_v60  ;;  %v105_v11 = vand.u32 255, %v41_v59  ;;  %v45_v12 = vunpack.c.1.s8 %v13_v60 }
  0x11   :  { %v223_v44 = vmul.f32 %v381_v39, %v152_v23  ;;  %v224_v45 = vmul.f32 %v381_v39, %v153_v28  ;;  %v225_v46 = vmul.f32 %v381_v39, %v154_v29  ;;  %v226_v48 = vmul.f32 %v381_v39, %v155_v32 }
  0x12   :  { %v227_v52 = vmul.f32 %v381_v39, %v156_v33  ;;  %v228_v56 = vmul.f32 %v381_v39, %v157_v35  ;;  %v229_v61 = vmul.f32 %v381_v39, %v158_v36  ;;  %v230_v1 = vmul.f32 %v381_v39, %v159_v49 }
  0x13   :  { %287 = vst [vmem:[%s676_s1] sm:$0xff] %v223_v44  ;;  %v231_v5 = vmul.f32 %v381_v39, %v160_v53  ;;  %v232_v9 = vmul.f32 %v381_v39, %v161_v57  ;;  %v233_v14 = vmul.f32 %v381_v39, %v162_v62  ;;  %v166_v15 = vcvt.s32.f32 %v102_v63 }
  0x14   :  { %288 = vst [vmem:[%s676_s1 + $0x8] sm:$0xff] %v224_v45  ;;  %v106_v16 = vand.u32 255, %v42_v0  ;;  %v46_v17 = vunpack.c.2.s8 %v13_v60  ;;  %v234_v18 = vmul.f32 %v381_v39, %v163_v2  ;;  %v167_v19 = vcvt.s32.f32 %v103_v3 }
  0x15   :  { %289 = vst [vmem:[%s676_s1 + $0x10] sm:$0xff] %v225_v46  ;;  %v107_v20 = vand.u32 255, %v43_v4  ;;  %v47_v21 = vunpack.c.3.s8 %v13_v60  ;;  %v235_v22 = vmul.f32 %v381_v39, %v164_v6  ;;  %v168_v23 = vcvt.s32.f32 %v104_v7 }
  0x16   :  { %290 = vst [vmem:[%s676_s1 + $0x18] sm:$0xff] %v226_v48  ;;  %v108_v24 = vand.u32 255, %v44_v8  ;;  %v48_v25 = vunpack.c.0.s8 %v14_v13  ;;  %v236_v26 = vmul.f32 %v381_v39, %v165_v10  ;;  %v169_v27 = vcvt.s32.f32 %v105_v11  ;;  %v16_v48 = vld [vmem:[%s675_s0 + $0x40] sm:$0x55] }
  0x17   :  { %291 = vst [vmem:[%s676_s1 + $0x20] sm:$0xff] %v227_v52  ;;  %v109_v28 = vand.u32 255, %v45_v12  ;;  %v49_v29 = vunpack.c.1.s8 %v14_v13  ;;  %v237_v31 = vmul.f32 %v381_v39, %v166_v15  ;;  %v170_v32 = vcvt.s32.f32 %v106_v16 }
  0x18   :  { %292 = vst [vmem:[%s676_s1 + $0x28] sm:$0xff] %v228_v56  ;;  %v110_v33 = vand.u32 255, %v46_v17  ;;  %v50_v34 = vunpack.c.2.s8 %v14_v13  ;;  %v238_v35 = vmul.f32 %v381_v39, %v167_v19  ;;  %v171_v36 = vcvt.s32.f32 %v107_v20 }
  0x19   :  { %293 = vst [vmem:[%s676_s1 + $0x30] sm:$0xff] %v229_v61  ;;  %v111_v37 = vand.u32 255, %v47_v21  ;;  %v51_v38 = vunpack.c.3.s8 %v14_v13  ;;  %v239_v40 = vmul.f32 %v381_v39, %v168_v23  ;;  %v172_v41 = vcvt.s32.f32 %v108_v24 }
  0x1a   :  { %294 = vst [vmem:[%s676_s1 + $0x38] sm:$0xff] %v230_v1  ;;  %v112_v42 = vand.u32 255, %v48_v25  ;;  %v52_v43 = vunpack.c.0.s8 %v15_v30  ;;  %v240_v44 = vmul.f32 %v381_v39, %v169_v27  ;;  %v173_v45 = vcvt.s32.f32 %v109_v28  ;;  %v17_v1 = vld [vmem:[%s675_s0 + $0x48] sm:$0x55] }
  0x1b   :  { %295 = vst [vmem:[%s676_s1 + $0x40] sm:$0xff] %v231_v5  ;;  %v113_v46 = vand.u32 255, %v49_v29  ;;  %v53_v47 = vunpack.c.1.s8 %v15_v30  ;;  %v241_v49 = vmul.f32 %v381_v39, %v170_v32  ;;  %v174_v50 = vcvt.s32.f32 %v110_v33 }
  0x1c   :  { %296 = vst [vmem:[%s676_s1 + $0x48] sm:$0xff] %v232_v9  ;;  %v114_v51 = vand.u32 255, %v50_v34  ;;  %v54_v52 = vunpack.c.2.s8 %v15_v30  ;;  %v242_v53 = vmul.f32 %v381_v39, %v171_v36  ;;  %v175_v54 = vcvt.s32.f32 %v111_v37 }
  0x1d   :  { %297 = vst [vmem:[%s676_s1 + $0x50] sm:$0xff] %v233_v14  ;;  %v115_v55 = vand.u32 255, %v51_v38  ;;  %v55_v56 = vunpack.c.3.s8 %v15_v30  ;;  %v243_v57 = vmul.f32 %v381_v39, %v172_v41  ;;  %v176_v58 = vcvt.s32.f32 %v112_v42 }
  0x1e   :  { %298 = vst [vmem:[%s676_s1 + $0x58] sm:$0xff] %v234_v18  ;;  %v116_v59 = vand.u32 255, %v52_v43  ;;  %v56_v60 = vunpack.c.0.s8 %v16_v48  ;;  %v244_v61 = vmul.f32 %v381_v39, %v173_v45  ;;  %v177_v62 = vcvt.s32.f32 %v113_v46  ;;  %v18_v18 = vld [vmem:[%s675_s0 + $0x50] sm:$0x55] }
  0x1f   :  { %299 = vst [vmem:[%s676_s1 + $0x60] sm:$0xff] %v235_v22  ;;  %v117_v63 = vand.u32 255, %v53_v47  ;;  %v57_v0 = vunpack.c.1.s8 %v16_v48  ;;  %v245_v2 = vmul.f32 %v381_v39, %v174_v50  ;;  %v178_v3 = vcvt.s32.f32 %v114_v51 }
  0x20   :  { %300 = vst [vmem:[%s676_s1 + $0x68] sm:$0xff] %v236_v26  ;;  %v118_v4 = vand.u32 255, %v54_v52  ;;  %v58_v5 = vunpack.c.2.s8 %v16_v48  ;;  %v246_v6 = vmul.f32 %v381_v39, %v175_v54  ;;  %v179_v7 = vcvt.s32.f32 %v115_v55 }
  0x21   :  { %301 = vst [vmem:[%s676_s1 + $0x70] sm:$0xff] %v237_v31  ;;  %v119_v8 = vand.u32 255, %v55_v56  ;;  %v59_v9 = vunpack.c.3.s8 %v16_v48  ;;  %v247_v10 = vmul.f32 %v381_v39, %v176_v58  ;;  %v180_v11 = vcvt.s32.f32 %v116_v59 }
  0x22   :  { %302 = vst [vmem:[%s676_s1 + $0x78] sm:$0xff] %v238_v35  ;;  %v120_v12 = vand.u32 255, %v56_v60  ;;  %v60_v13 = vunpack.c.0.s8 %v17_v1  ;;  %v248_v14 = vmul.f32 %v381_v39, %v177_v62  ;;  %v181_v15 = vcvt.s32.f32 %v117_v63  ;;  %v19_v35 = vld [vmem:[%s675_s0 + $0x58] sm:$0x55] }
  0x23   :  { %303 = vst [vmem:[%s676_s1 + $0x80] sm:$0xff] %v239_v40  ;;  %v121_v16 = vand.u32 255, %v57_v0  ;;  %v61_v17 = vunpack.c.1.s8 %v17_v1  ;;  %v249_v19 = vmul.f32 %v381_v39, %v178_v3  ;;  %v182_v20 = vcvt.s32.f32 %v118_v4 }
  0x24   :  { %304 = vst [vmem:[%s676_s1 + $0x88] sm:$0xff] %v240_v44  ;;  %v122_v21 = vand.u32 255, %v58_v5  ;;  %v62_v22 = vunpack.c.2.s8 %v17_v1  ;;  %v250_v23 = vmul.f32 %v381_v39, %v179_v7  ;;  %v183_v24 = vcvt.s32.f32 %v119_v8 }
  0x25   :  { %305 = vst [vmem:[%s676_s1 + $0x90] sm:$0xff] %v241_v49  ;;  %v123_v25 = vand.u32 255, %v59_v9  ;;  %v63_v26 = vunpack.c.3.s8 %v17_v1  ;;  %v251_v27 = vmul.f32 %v381_v39, %v180_v11  ;;  %v184_v28 = vcvt.s32.f32 %v120_v12 }
  0x26   :  { %306 = vst [vmem:[%s676_s1 + $0x98] sm:$0xff] %v242_v53  ;;  %v124_v29 = vand.u32 255, %v60_v13  ;;  %v64_v30 = vunpack.c.0.s8 %v18_v18  ;;  %v252_v31 = vmul.f32 %v381_v39, %v181_v15  ;;  %v185_v32 = vcvt.s32.f32 %v121_v16  ;;  %v20_v53 = vld [vmem:[%s675_s0 + $0x60] sm:$0x55] }
  0x27   :  { %307 = vst [vmem:[%s676_s1 + $0xa0] sm:$0xff] %v243_v57  ;;  %v125_v33 = vand.u32 255, %v61_v17  ;;  %v65_v34 = vunpack.c.1.s8 %v18_v18  ;;  %v253_v36 = vmul.f32 %v381_v39, %v182_v20  ;;  %v186_v37 = vcvt.s32.f32 %v122_v21 }
  0x28   :  { %308 = vst [vmem:[%s676_s1 + $0xa8] sm:$0xff] %v244_v61  ;;  %v126_v38 = vand.u32 255, %v62_v22  ;;  %v66_v40 = vunpack.c.2.s8 %v18_v18  ;;  %v254_v41 = vmul.f32 %v381_v39, %v183_v24  ;;  %v187_v42 = vcvt.s32.f32 %v123_v25 }
  0x29   :  { %309 = vst [vmem:[%s676_s1 + $0xb0] sm:$0xff] %v245_v2  ;;  %v127_v43 = vand.u32 255, %v63_v26  ;;  %v67_v44 = vunpack.c.3.s8 %v18_v18  ;;  %v255_v45 = vmul.f32 %v381_v39, %v184_v28  ;;  %v188_v46 = vcvt.s32.f32 %v124_v29 }
  0x2a   :  { %310 = vst [vmem:[%s676_s1 + $0xb8] sm:$0xff] %v246_v6  ;;  %v128_v47 = vand.u32 255, %v64_v30  ;;  %v68_v48 = vunpack.c.0.s8 %v19_v35  ;;  %v256_v49 = vmul.f32 %v381_v39, %v185_v32  ;;  %v189_v50 = vcvt.s32.f32 %v125_v33  ;;  %v21_v6 = vld [vmem:[%s675_s0 + $0x68] sm:$0x55] }
  0x2b   :  { %311 = vst [vmem:[%s676_s1 + $0xc0] sm:$0xff] %v247_v10  ;;  %v129_v51 = vand.u32 255, %v65_v34  ;;  %v69_v52 = vunpack.c.1.s8 %v19_v35  ;;  %v257_v54 = vmul.f32 %v381_v39, %v186_v37  ;;  %v190_v55 = vcvt.s32.f32 %v126_v38 }
  0x2c   :  { %312 = vst [vmem:[%s676_s1 + $0xc8] sm:$0xff] %v248_v14  ;;  %v130_v56 = vand.u32 255, %v66_v40  ;;  %v70_v57 = vunpack.c.2.s8 %v19_v35  ;;  %v258_v58 = vmul.f32 %v381_v39, %v187_v42  ;;  %v191_v59 = vcvt.s32.f32 %v127_v43 }
  0x2d   :  { %313 = vst [vmem:[%s676_s1 + $0xd0] sm:$0xff] %v249_v19  ;;  %v131_v60 = vand.u32 255, %v67_v44  ;;  %v71_v61 = vunpack.c.3.s8 %v19_v35  ;;  %v259_v62 = vmul.f32 %v381_v39, %v188_v46  ;;  %v192_v63 = vcvt.s32.f32 %v128_v47 }
  0x2e   :  { %314 = vst [vmem:[%s676_s1 + $0xd8] sm:$0xff] %v250_v23  ;;  %v132_v0 = vand.u32 255, %v68_v48  ;;  %v72_v1 = vunpack.c.0.s8 %v20_v53  ;;  %v260_v2 = vmul.f32 %v381_v39, %v189_v50  ;;  %v193_v3 = vcvt.s32.f32 %v129_v51  ;;  %v22_v23 = vld [vmem:[%s675_s0 + $0x70] sm:$0x55] }
  0x2f   :  { %315 = vst [vmem:[%s676_s1 + $0xe0] sm:$0xff] %v251_v27  ;;  %v133_v4 = vand.u32 255, %v69_v52  ;;  %v73_v5 = vunpack.c.1.s8 %v20_v53  ;;  %v261_v7 = vmul.f32 %v381_v39, %v190_v55  ;;  %v194_v8 = vcvt.s32.f32 %v130_v56 }
  0x30   :  { %316 = vst [vmem:[%s676_s1 + $0xe8] sm:$0xff] %v252_v31  ;;  %v134_v9 = vand.u32 255, %v70_v57  ;;  %v74_v10 = vunpack.c.2.s8 %v20_v53  ;;  %v262_v11 = vmul.f32 %v381_v39, %v191_v59  ;;  %v195_v12 = vcvt.s32.f32 %v131_v60 }
  0x31   :  { %317 = vst [vmem:[%s676_s1 + $0xf0] sm:$0xff] %v253_v36  ;;  %v135_v13 = vand.u32 255, %v71_v61  ;;  %v75_v14 = vunpack.c.3.s8 %v20_v53  ;;  %v263_v15 = vmul.f32 %v381_v39, %v192_v63  ;;  %v196_v16 = vcvt.s32.f32 %v132_v0 }
  0x32   :  { %318 = vst [vmem:[%s676_s1 + $0xf8] sm:$0xff] %v254_v41  ;;  %v136_v17 = vand.u32 255, %v72_v1  ;;  %v76_v18 = vunpack.c.0.s8 %v21_v6  ;;  %v264_v19 = vmul.f32 %v381_v39, %v193_v3  ;;  %v197_v20 = vcvt.s32.f32 %v133_v4  ;;  %v23_v41 = vld [vmem:[%s675_s0 + $0x78] sm:$0x55] }
  0x33   :  { %319 = vst [vmem:[%s676_s1 + $0x100] sm:$0xf] %v255_v45  ;;  %v137_v21 = vand.u32 255, %v73_v5  ;;  %v77_v22 = vunpack.c.1.s8 %v21_v6  ;;  %v265_v24 = vmul.f32 %v381_v39, %v194_v8  ;;  %v198_v25 = vcvt.s32.f32 %v134_v9 }
  0x34   :  { %320 = vst [vmem:[%s676_s1 + $0x108] sm:$0xf] %v256_v49  ;;  %v138_v26 = vand.u32 255, %v74_v10  ;;  %v78_v27 = vunpack.c.2.s8 %v21_v6  ;;  %v266_v28 = vmul.f32 %v381_v39, %v195_v12  ;;  %v199_v29 = vcvt.s32.f32 %v135_v13 }
  0x35   :  { %321 = vst [vmem:[%s676_s1 + $0x110] sm:$0xf] %v257_v54  ;;  %v139_v30 = vand.u32 255, %v75_v14  ;;  %v79_v31 = vunpack.c.3.s8 %v21_v6  ;;  %v267_v32 = vmul.f32 %v381_v39, %v196_v16  ;;  %v200_v33 = vcvt.s32.f32 %v136_v17 }
  0x36   :  { %322 = vst [vmem:[%s676_s1 + $0x118] sm:$0xf] %v258_v58  ;;  %v140_v34 = vand.u32 255, %v76_v18  ;;  %v80_v35 = vunpack.c.0.s8 %v22_v23  ;;  %v268_v36 = vmul.f32 %v381_v39, %v197_v20  ;;  %v201_v37 = vcvt.s32.f32 %v137_v21 }
  0x37   :  { %323 = vst [vmem:[%s676_s1 + $0x120] sm:$0xf] %v259_v62  ;;  %v141_v38 = vand.u32 255, %v77_v22  ;;  %v81_v40 = vunpack.c.1.s8 %v22_v23  ;;  %v269_v42 = vmul.f32 %v381_v39, %v198_v25  ;;  %v202_v43 = vcvt.s32.f32 %v138_v26 }
  0x38   :  { %324 = vst [vmem:[%s676_s1 + $0x128] sm:$0xf] %v260_v2  ;;  %v142_v44 = vand.u32 255, %v78_v27  ;;  %v82_v45 = vunpack.c.2.s8 %v22_v23  ;;  %v270_v46 = vmul.f32 %v381_v39, %v199_v29  ;;  %v203_v47 = vcvt.s32.f32 %v139_v30 }
  0x39   :  { %325 = vst [vmem:[%s676_s1 + $0x130] sm:$0xf] %v261_v7  ;;  %v143_v48 = vand.u32 255, %v79_v31  ;;  %v83_v49 = vunpack.c.3.s8 %v22_v23  ;;  %v271_v50 = vmul.f32 %v381_v39, %v200_v33  ;;  %v204_v51 = vcvt.s32.f32 %v140_v34 }
  0x3a   :  { %326 = vst [vmem:[%s676_s1 + $0x138] sm:$0xf] %v262_v11  ;;  %v144_v52 = vand.u32 255, %v80_v35  ;;  %v84_v53 = vunpack.c.0.s8 %v23_v41  ;;  %v272_v54 = vmul.f32 %v381_v39, %v201_v37  ;;  %v205_v55 = vcvt.s32.f32 %v141_v38 }
  0x3b   :  { %327 = vst [vmem:[%s676_s1 + $0x140] sm:$0xf] %v263_v15  ;;  %v145_v56 = vand.u32 255, %v81_v40  ;;  %v85_v57 = vunpack.c.1.s8 %v23_v41  ;;  %v273_v58 = vmul.f32 %v381_v39, %v202_v43  ;;  %v206_v59 = vcvt.s32.f32 %v142_v44 }
  0x3c   :  { %328 = vst [vmem:[%s676_s1 + $0x148] sm:$0xf] %v264_v19  ;;  %v146_v60 = vand.u32 255, %v82_v45  ;;  %v86_v61 = vunpack.c.2.s8 %v23_v41  ;;  %v274_v62 = vmul.f32 %v381_v39, %v203_v47  ;;  %v207_v63 = vcvt.s32.f32 %v143_v48 }
  0x3d   :  { %329 = vst [vmem:[%s676_s1 + $0x150] sm:$0xf] %v265_v24  ;;  %v147_v0 = vand.u32 255, %v83_v49  ;;  %v87_v1 = vunpack.c.3.s8 %v23_v41  ;;  %v275_v2 = vmul.f32 %v381_v39, %v204_v51  ;;  %v208_v3 = vcvt.s32.f32 %v144_v52 }
  0x3e   :  { %330 = vst [vmem:[%s676_s1 + $0x158] sm:$0xf] %v266_v28  ;;  %v148_v4 = vand.u32 255, %v84_v53  ;;  %v276_v5 = vmul.f32 %v381_v39, %v205_v55  ;;  %v209_v6 = vcvt.s32.f32 %v145_v56  ;;  %v149_v7 = vand.u32 255, %v85_v57 }
  0x3f   :  { %331 = vst [vmem:[%s676_s1 + $0x160] sm:$0xf] %v267_v32  ;;  %v277_v8 = vmul.f32 %v381_v39, %v206_v59  ;;  %v210_v9 = vcvt.s32.f32 %v146_v60  ;;  %v150_v10 = vand.u32 255, %v86_v61  ;;  %v278_v11 = vmul.f32 %v381_v39, %v207_v63 }
  0x40   :  { %332 = vst [vmem:[%s676_s1 + $0x168] sm:$0xf] %v268_v36  ;;  %v211_v12 = vcvt.s32.f32 %v147_v0  ;;  %v151_v13 = vand.u32 255, %v87_v1  ;;  %v279_v14 = vmul.f32 %v381_v39, %v208_v3  ;;  %v212_v15 = vcvt.s32.f32 %v148_v4 }
  0x41   :  { %333 = vst [vmem:[%s676_s1 + $0x170] sm:$0xf] %v269_v42  ;;  %v280_v16 = vmul.f32 %v381_v39, %v209_v6  ;;  %v213_v17 = vcvt.s32.f32 %v149_v7  ;;  %v281_v18 = vmul.f32 %v381_v39, %v210_v9  ;;  %v214_v19 = vcvt.s32.f32 %v150_v10 }
  0x42   :  { %334 = vst [vmem:[%s676_s1 + $0x178] sm:$0xf] %v270_v46  ;;  %v282_v20 = vmul.f32 %v381_v39, %v211_v12  ;;  %v215_v21 = vcvt.s32.f32 %v151_v13  ;;  %v283_v22 = vmul.f32 %v381_v39, %v212_v15 }
  0x43   :  { %335 = vst [vmem:[%s676_s1 + $0x180] sm:$0xf] %v271_v50  ;;  %v284_v23 = vmul.f32 %v381_v39, %v213_v17  ;;  %v285_v24 = vmul.f32 %v381_v39, %v214_v19 }
  0x44   :  { %336 = vst [vmem:[%s676_s1 + $0x188] sm:$0xf] %v272_v54  ;;  %v286_v25 = vmul.f32 %v381_v39, %v215_v21 }
  0x45   :  { %337 = vst [vmem:[%s676_s1 + $0x190] sm:$0xf] %v273_v58 }
  0x46   :  { %338 = vst [vmem:[%s676_s1 + $0x198] sm:$0xf] %v274_v62 }
  0x47   :  { %339 = vst [vmem:[%s676_s1 + $0x1a0] sm:$0xf] %v275_v2 }
  0x48   :  { %340 = vst [vmem:[%s676_s1 + $0x1a8] sm:$0xf] %v276_v5 }
  0x49   :  { %341 = vst [vmem:[%s676_s1 + $0x1b0] sm:$0xf] %v277_v8 }
  0x4a   :  { %342 = vst [vmem:[%s676_s1 + $0x1b8] sm:$0xf] %v278_v11 }
  0x4b   :  { %343 = vst [vmem:[%s676_s1 + $0x1c0] sm:$0xf] %v279_v14 }
  0x4c   :  { %344 = vst [vmem:[%s676_s1 + $0x1c8] sm:$0xf] %v280_v16 }
  0x4d   :  { %345 = vst [vmem:[%s676_s1 + $0x1d0] sm:$0xf] %v281_v18 }
  0x4e   :  { %346 = vst [vmem:[%s676_s1 + $0x1d8] sm:$0xf] %v282_v20 }
  0x4f   :  { %347 = vst [vmem:[%s676_s1 + $0x1e0] sm:$0xf] %v283_v22 }
  0x50   :  { %348 = vst [vmem:[%s676_s1 + $0x1e8] sm:$0xf] %v284_v23 }
  0x51   :  { %349 = vst [vmem:[%s676_s1 + $0x1f0] sm:$0xf] %v285_v24 }
  0x52   :  { %350 = vst [vmem:[%s676_s1 + $0x1f8] sm:$0xf] %v286_v25 }

</bundles_post_ra>
